<compile_context>
chip_gen: v7x
topology: tpu7x:2x2x1
jax: 0.10.0
libtpu: 0.0.40
codegen_flags: <defaults>
</compile_context>

<pallas_src>
import functools

import jax
import jax.numpy as jnp
from jax.experimental import pallas as pl
from jax.experimental.pallas import tpu as pltpu


def _round_up(x: int, m: int) -> int:
    return ((x + m - 1) // m) * m


def _patch_embed_kernel(x_ref, w_ref, b_ref, o_ref, acc_ref):
    """One (tm, tn) output tile of patches @ weight + bias, reduced over K."""
    k = pl.program_id(2)

    @pl.when(k == 0)
    def _():
        acc_ref[...] = jnp.zeros_like(acc_ref)

    acc_ref[...] += jnp.dot(
        x_ref[...], w_ref[...], preferred_element_type=jnp.float32)

    @pl.when(k == pl.num_programs(2) - 1)
    def _():
        o_ref[...] = (acc_ref[...] + b_ref[...]).astype(o_ref.dtype)


def _tiled_matmul_bias(xp, w2, b2, *, tm, tn, tk):
    m_pad, k_pad = xp.shape
    _, e_pad = w2.shape
    grid = (m_pad // tm, e_pad // tn, k_pad // tk)

    # Double-buffered in/out tiles + f32 accumulator scratch, plus headroom.
    buf_bytes = 2 * (tm * tk * xp.dtype.itemsize
                     + tk * tn * w2.dtype.itemsize
                     + tn * b2.dtype.itemsize
                     + tm * tn * 4) + tm * tn * 4
    vmem_limit = int(min(48 * 1024 * 1024, buf_bytes + 16 * 1024 * 1024))

    return pl.pallas_call(
        _patch_embed_kernel,
        out_shape=jax.ShapeDtypeStruct((m_pad, e_pad), jnp.float32),
        grid=grid,
        in_specs=[
            pl.BlockSpec((tm, tk), lambda i, j, k: (i, k)),   # patches
            pl.BlockSpec((tk, tn), lambda i, j, k: (k, j)),   # weight
            pl.BlockSpec((1, tn), lambda i, j, k: (0, j)),    # bias
        ],
        out_specs=pl.BlockSpec((tm, tn), lambda i, j, k: (i, j)),
        scratch_shapes=[pltpu.VMEM((tm, tn), jnp.float32)],
        compiler_params=pltpu.CompilerParams(
            dimension_semantics=("parallel", "parallel", "arbitrary"),
            vmem_limit_bytes=vmem_limit,
            allow_input_fusion=[True, False, False],
        ),
    )(xp, w2, b2)


@functools.partial(jax.jit, static_argnums=3)
def patch_embedding_forward(x, weight, bias, patch_size):
    """x: (B, C, S, S), weight: (E, C, ps, ps), bias: (E,) -> (B, P, E)."""
    B, C, S, _ = x.shape
    ps = patch_size
    hp = S // ps
    n_patches = hp * hp
    E = weight.shape[0]
    K = C * ps * ps
    M = B * n_patches

    # Patch extraction; K ordering is (c, i, j), matching the conv-weight
    # reshape below. Under jit this is an XLA transpose fusion, and
    # allow_input_fusion lets XLA fold it into the Pallas input when supported.
    # TODO(synk): move patch extraction fully into the kernel (BlockSpec over a
    # (C, ps, S) band + in-VMEM reorder) to guarantee zero HBM materialization.
    xp = x.reshape(B, C, hp, ps, hp, ps)
    xp = jnp.transpose(xp, (0, 2, 4, 1, 3, 5)).reshape(M, K)

    w2 = weight.reshape(E, K).T                       # (K, E), rows = (c, i, j)
    b2 = bias.reshape(1, E).astype(jnp.float32)

    # Tile sizes: lane dims (K, E) multiples of 128; M a multiple of 16 (bf16
    # sublane pack). Small configs collapse to one tile; ViT-scale ones tile.
    tm = min(512, _round_up(M, 16))
    tk = min(512, _round_up(K, 128))
    tn = min(256, _round_up(E, 128))
    m_pad = _round_up(M, tm)
    k_pad = _round_up(K, tk)
    e_pad = _round_up(E, tn)

    # bf16 MXU operands (f32 accumulation in-kernel); zero padding is exact.
    xp_p = jnp.pad(xp.astype(jnp.bfloat16), ((0, m_pad - M), (0, k_pad - K)))
    w2_p = jnp.pad(w2.astype(jnp.bfloat16), ((0, k_pad - K), (0, e_pad - E)))
    b2_p = jnp.pad(b2, ((0, 0), (0, e_pad - E)))

    out = _tiled_matmul_bias(xp_p, w2_p, b2_p, tm=tm, tn=tn, tk=tk)
    return out[:M, :E].reshape(B, n_patches, E)


if __name__ == "__main__":
    # Small config: image_size=16, patch_size=4, in_channels=4, embedding_dim=32
    image_size = 16
    patch_size = 4
    in_channels = 4
    embedding_dim = 32
    batch = 2

    key = jax.random.PRNGKey(0)
    kx, kw, kb = jax.random.split(key, 3)

    x = jax.random.normal(
        kx, (batch, in_channels, image_size, image_size), dtype=jnp.float32)
    fan_in = in_channels * patch_size * patch_size
    bound = 1.0 / (fan_in ** 0.5)
    weight = jax.random.uniform(
        kw, (embedding_dim, in_channels, patch_size, patch_size),
        minval=-bound, maxval=bound, dtype=jnp.float32)
    bias = jax.random.uniform(
        kb, (embedding_dim,), minval=-bound, maxval=bound, dtype=jnp.float32)

    out = patch_embedding_forward(x, weight, bias, patch_size)
    out = jax.block_until_ready(out)

    n_patches = (image_size // patch_size) ** 2
    assert out.shape == (batch, n_patches, embedding_dim)

    # Reference: lax conv on bf16-rounded operands (kernel feeds the MXU bf16
    # with f32 accumulation), full-precision conv math.
    ref = jax.lax.conv_general_dilated(
        x.astype(jnp.bfloat16).astype(jnp.float32),
        weight.astype(jnp.bfloat16).astype(jnp.float32),
        window_strides=(patch_size, patch_size), padding="VALID",
        dimension_numbers=("NCHW", "OIHW", "NCHW"),
        precision=jax.lax.Precision.HIGHEST)
    ref = ref + bias[None, :, None, None]
    ref = ref.reshape(batch, embedding_dim, -1).transpose(0, 2, 1)

    assert jnp.allclose(out, ref, atol=1e-2, rtol=1e-2), float(
        jnp.max(jnp.abs(out - ref)))
    print("KERNEL_OK")
</pallas_src>

<mosaic_0001>
module attributes {stable_mosaic.version = 11 : i64} {
  func.func @_patch_embed_kernel(%arg0: i32, %arg1: i32, %arg2: i32, %arg3: memref<32x128xbf16, #tpu.memory_space<vmem>>, %arg4: memref<128x128xbf16, #tpu.memory_space<vmem>>, %arg5: memref<1x128xf32, #tpu.memory_space<vmem>>, %arg6: memref<32x128xf32, #tpu.memory_space<vmem>>, %arg7: memref<32x128xf32, #tpu.memory_space<vmem>>) attributes {dimension_semantics = [#tpu.dimension_semantics<parallel>, #tpu.dimension_semantics<parallel>, #tpu.dimension_semantics<arbitrary>], iteration_bounds = array<i64: 1, 1, 1>, scalar_prefetch = 0 : i64, scratch_operands = 1 : i64, tpu.core_type = #tpu.core_type<tc>, window_params = [{transform_indices = @transform_0, window_bounds = array<i64: 32, 128>}, {transform_indices = @transform_1, window_bounds = array<i64: 128, 128>}, {transform_indices = @transform_2, window_bounds = array<i64: 1, 128>}, {transform_indices = @transform_3, window_bounds = array<i64: 32, 128>}]} {
    %c0_i32 = arith.constant 0 : i32
    %0 = arith.cmpi eq, %arg2, %c0_i32 : i32
    %1 = arith.extui %0 : i1 to i32
    %c0_i32_0 = arith.constant 0 : i32
    %2 = arith.cmpi ne, %1, %c0_i32_0 : i32
    scf.if %2 {
      %cst_10 = arith.constant 0.000000e+00 : f32
      %12 = vector.broadcast %cst_10 : f32 to vector<32x128xf32>
      %c0_11 = arith.constant 0 : index
      %c0_12 = arith.constant 0 : index
      %13 = vector.load %arg7[%c0_11, %c0_12] : memref<32x128xf32, #tpu.memory_space<vmem>>, vector<32x128xf32>
      tpu.vector_store %arg7[%c0_11, %c0_12], %12 {strides = array<i32>} : memref<32x128xf32, #tpu.memory_space<vmem>>, vector<32x128xf32>,
    } else {
    }
    %c0 = arith.constant 0 : index
    %c0_1 = arith.constant 0 : index
    %3 = vector.load %arg7[%c0, %c0_1] : memref<32x128xf32, #tpu.memory_space<vmem>>, vector<32x128xf32>
    %c0_2 = arith.constant 0 : index
    %c0_3 = arith.constant 0 : index
    %4 = vector.load %arg3[%c0_2, %c0_3] : memref<32x128xbf16, #tpu.memory_space<vmem>>, vector<32x128xbf16>
    %c0_4 = arith.constant 0 : index
    %c0_5 = arith.constant 0 : index
    %5 = vector.load %arg4[%c0_4, %c0_5] : memref<128x128xbf16, #tpu.memory_space<vmem>>, vector<128x128xbf16>
    %cst = arith.constant dense<0.000000e+00> : vector<32x128xf32>
    %6 = tpu.matmul %4, %5, %cst {dimension_numbers = #tpu.dot_dimension_numbers<[1], [0], [0], [1], [0, 0, 1, 1], [], []>} : vector<32x128xbf16>, vector<128x128xbf16>, vector<32x128xf32> -> vector<32x128xf32>
    %7 = arith.addf %3, %6 : vector<32x128xf32>
    %c0_6 = arith.constant 0 : index
    %c0_7 = arith.constant 0 : index
    %8 = vector.load %arg7[%c0_6, %c0_7] : memref<32x128xf32, #tpu.memory_space<vmem>>, vector<32x128xf32>
    tpu.vector_store %arg7[%c0_6, %c0_7], %7 {strides = array<i32>} : memref<32x128xf32, #tpu.memory_space<vmem>>, vector<32x128xf32>,
    %c0_i32_8 = arith.constant 0 : i32
    %9 = arith.cmpi eq, %arg2, %c0_i32_8 : i32
    %10 = arith.extui %9 : i1 to i32
    %c0_i32_9 = arith.constant 0 : i32
    %11 = arith.cmpi ne, %10, %c0_i32_9 : i32
    scf.if %11 {
      %c0_10 = arith.constant 0 : index
      %c0_11 = arith.constant 0 : index
      %12 = vector.load %arg7[%c0_10, %c0_11] : memref<32x128xf32, #tpu.memory_space<vmem>>, vector<32x128xf32>
      %c0_12 = arith.constant 0 : index
      %c0_13 = arith.constant 0 : index
      %13 = vector.load %arg5[%c0_12, %c0_13] : memref<1x128xf32, #tpu.memory_space<vmem>>, vector<1x128xf32>
      %14 = vector.broadcast %13 : vector<1x128xf32> to vector<32x128xf32>
      %15 = arith.addf %12, %14 : vector<32x128xf32>
      %c0_14 = arith.constant 0 : index
      %c0_15 = arith.constant 0 : index
      %16 = vector.load %arg6[%c0_14, %c0_15] : memref<32x128xf32, #tpu.memory_space<vmem>>, vector<32x128xf32>
      tpu.vector_store %arg6[%c0_14, %c0_15], %15 {strides = array<i32>} : memref<32x128xf32, #tpu.memory_space<vmem>>, vector<32x128xf32>,
    } else {
    }
    return
  }
  func.func @transform_0(%arg0: i32, %arg1: i32, %arg2: i32) -> (i32, i32) {
    %c0_i32 = arith.constant 0 : i32
    return %arg0, %arg2 : i32, i32
  }
  func.func @transform_1(%arg0: i32, %arg1: i32, %arg2: i32) -> (i32, i32) {
    %c0_i32 = arith.constant 0 : i32
    return %arg2, %arg1 : i32, i32
  }
  func.func @transform_2(%arg0: i32, %arg1: i32, %arg2: i32) -> (i32, i32) {
    %c0_i32 = arith.constant 0 : i32
    %c0_i32_0 = arith.constant 0 : i32
    return %c0_i32, %arg1 : i32, i32
  }
  func.func @transform_3(%arg0: i32, %arg1: i32, %arg2: i32) -> (i32, i32) {
    %c0_i32 = arith.constant 0 : i32
    return %arg0, %arg1 : i32, i32
  }
}

</mosaic_0001>

<bundles_post_ra>
// kernel: patch_embedding_forward.2
= control target key start
LH: loop header
LB: loop body
LE: loop exit
PB: predicated region body
PF: predicated region fallthrough
CT: control target
= control target key end

     0   :  { %s454_s0 = inlined_call_operand.vmem [shape: bf16[128,128], index: 0, kind: input, shape index: {}]   ;;  %s455_s1 = inlined_call_operand.vmem [shape: f32[1,128], index: 1, kind: input, shape index: {}]   ;;  %s456_s2 = inlined_call_operand.vmem [shape: bf16[32,64], index: 2, kind: input, shape index: {}]   ;;  %s457_s3 = inlined_call_operand.<no memory space> [shape: bf16[], index: 3, kind: input, shape index: {}]   ;;  %s458_s4 = inlined_call_operand.hbm [shape: f32[32,128], index: 4, kind: output, shape index: {}]  }
   0x1   :  { %v9_v0 = vstv %s457_s3 }
   0x2   :  { %v10_v1 = vunpack.i.l.bf16 %v9_v0 }
   0x3   :  { %v343_v2 = vld [vmem:[%s454_s0] sm:$0xff]   ;;  %v33_v3 = vlaneseq  ;;  %v344_v4 = vld [vmem:[%s454_s0 + $0x8] sm:$0xff]   ;;  %v345_v5 = vld [vmem:[%s454_s0 + $0x10] sm:$0xff]  }
   0x4   :  { %319 = vmatprep.subr.bf16.mxu0 %v343_v2  ;;  %v346_v7 = vld [vmem:[%s454_s0 + $0x18] sm:$0xff]   ;;  %v30_v8 = vld [vmem:[%s456_s2] sm:$0xff]   ;;  %v296_v9 = vld [vmem:[%s456_s2 + $0x8] sm:$0xff]  }
   0x5   :  { %320 = vmatpush3.bf16.msra.mxu0 %v343_v2  ;;  %v34_v6 = vand.u32 127, %v33_v3 }
   0x6   :  { %321 = vmatprep.subr.bf16.mxu0 %v344_v4 }
   0x7   :  { %vm36_vm0 = vcmp.lt.s32.totalorder %v34_v6, 64 }
   0x9   :  { %322 = vmatpush3.bf16.msra.mxu0 %v344_v4 }
   0xa   :  { %323 = vmatprep.subr.bf16.mxu0 %v345_v5 }
   0xb   :  { %14 = vsyncpa [#allocation9], 0  ;;  %v31_v10 = vunpack.c.l.bf16 %v30_v8  ;;  %v52_v11 = vunpack.c.h.bf16 %v30_v8  ;;  %v74_v12 = vunpack.c.l.bf16 %v296_v9  ;;  %v96_v13 = vunpack.c.h.bf16 %v296_v9  ;;  %v347_v18 = vld [vmem:[%s454_s0 + $0x20] sm:$0xff]   ;;  %v348_v24 = vld [vmem:[%s454_s0 + $0x28] sm:$0xff]   ;;  %s378_s11 = smov [#allocation8]  }
   0xc   :  { %v377_v19 = vmov 0.0   ;;  %v349_v25 = vld [vmem:[%s454_s0 + $0x30] sm:$0xff]   ;;  %v350_v27 = vld [vmem:[%s454_s0 + $0x38] sm:$0xff]   ;;  %v308_v29 = vld [vmem:[%s455_s1] ss:$0 sm:$0xff]  ;;  %s284_s12 = sshll.u32 %s378_s11, 4  ;;  %s285_s12 = int_to_ptr.vmem [resolvable:$true] %s284_s12 }
   0xd   :  { %324 = vmatpush3.bf16.msra.mxu0 %v345_v5  ;;  %v37_v14 = vsel %vm36_vm0, %v31_v10, %v10_v1  ;;  %v58_v15 = vsel %vm36_vm0, %v52_v11, %v10_v1  ;;  %v80_v16 = vsel %vm36_vm0, %v74_v12, %v10_v1  ;;  %v102_v17 = vsel %vm36_vm0, %v96_v13, %v10_v1  ;;  %s353_s0 = scalar_lea.vmem %s285_s12, 512  ;;  %p358_p1 = scmp.lt.s32.totalorder %s285_s12, %s285_s12 }
   0xe   :  { %325 = vmatprep.subr.bf16.mxu0 %v346_v7  ;;  %v38_v20 = vpack.c.bf16 %v377_v19, %v37_v14  ;;  %v60_v21 = vpack.c.bf16 %v377_v19, %v58_v15  ;;  %v82_v22 = vpack.c.bf16 %v377_v19, %v80_v16  ;;  %v104_v23 = vpack.c.bf16 %v377_v19, %v102_v17  ;;  %p354_p0 = scmp.ne.s32.totalorder %s285_s12, %s353_s0  ;;  %p359_p2 = scmp.lt.s32.totalorder %s353_s0, %s353_s0 }
  0x10   :  { %40 = vst [vmem:[#allocation10] sm:$0xf] %v38_v20  ;;  %62 = vst [vmem:[#allocation10 + $0x4] sm:$0xf] %v60_v21  ;;  %p360_p3 = por %p359_p2, %p358_p1 }
  0x11   :  { %84 = vst [vmem:[#allocation10 + $0x8] sm:$0xf] %v82_v22  ;;  %106 = vst [vmem:[#allocation10 + $0xc] sm:$0xf] %v104_v23  ;;  %326 = vmatpush3.bf16.msra.mxu0 %v346_v7 }
  0x12   :  { %327 = vmatprep.subr.bf16.mxu0 %v347_v18  ;;  %p361_p4 = pnand %p360_p3, %p354_p0 }
  0x15   :  { %328 = vmatpush3.bf16.msra.mxu0 %v347_v18 }
  0x16   :  { %329 = vmatprep.subr.bf16.mxu0 %v348_v24 }
  0x17   :  { %v351_v26 = vld [vmem:[#allocation10] sm:$0xff]  }
  0x18   :  { %335 = vmatprep.mubr.bf16.mxu0 %v351_v26  ;;  %v352_v28 = vld [vmem:[#allocation10 + $0x8] sm:$0xff]  }
  0x19   :  { %330 = vmatpush3.bf16.msra.mxu0 %v348_v24 }
  0x1a   :  { %331 = vmatprep.subr.bf16.mxu0 %v349_v25 }
  0x1d   :  { %332 = vmatpush3.bf16.msra.mxu0 %v349_v25 }
  0x1e   :  { %333 = vmatprep.subr.bf16.mxu0 %v350_v27 }
  0x21   :  { %334 = vmatpush3.bf16.msra.mxu0 %v350_v27 }
  0x24   :  { %336 = vmatmul.mubr.bf16.vlgmr.msra.gmra.mrb[0].mxu0 %v352_v28 }
  0xf7   :  { %v337_v30 = vpop.f32.mrb[0].mxu0 }
  0xf8   :  { %v273_v31 = vadd.f32 %v337_v30, %v308_v29  ;;  %v234_v32 = vpop.f32.mrb[1].mxu0 }
  0xf9   :  { %v271_v33 = vadd.f32 %v308_v29, %v234_v32  ;;  %v338_v34 = vpop.f32.mrb[2].mxu0 }
  0xfa   :  { %277 = vst [vmem:[#allocation8 + $0x10] sm:$0xff] %v273_v31  ;;  %v274_v35 = vadd.f32 %v338_v34, %v308_v29  ;;  %v237_v36 = vpop.f32.mrb[3].mxu0 }
  0xfb   :  { %275 = vst [vmem:[#allocation8] sm:$0xff] %v271_v33  ;;  %v272_v37 = vadd.f32 %v308_v29, %v237_v36 }
  0xfc   :  { %278 = vst [vmem:[#allocation8 + $0x18] sm:$0xff] %v274_v35 }
  0xfd   :  { %276 = vst [vmem:[#allocation8 + $0x8] sm:$0xff] %v272_v37 }
  0xfe   :  { %364 = shalt.err (!%p361_p4)
}
  0xff   :  { %s365_s14 = scalar_lea.hbm %s458_s4, 512 }
 0x100   :  { %p366_p5 = scmp.ne.s32.totalorder %s458_s4, %s365_s14  ;;  %p369_p6 = scmp.lt.u32.totalorder %s365_s14, %s458_s4 }
 0x102   :  { %p371_p7 = pnand %p369_p6, %p366_p5 }
 0x104   :  { %374 = shalt.err (!%p371_p7)
}
 0x105   :  { %s379_s19 = smov 128   ;;  %s380_s20 = smov 8  }
 0x106   :  { %290 = dma.vmem_to_hbm [thread:$0]  %s285_s12, 512, %s458_s4, [#allocation9], %s379_s19, %s379_s19, %s380_s20  }
 0x107   :  { %375 = dma.done.wait [#allocation9], 512  }
 0x108   :  { %376 = vsyncadd [#allocation9], 4294966784 }
 0x109   :  { %294 = vsyncpa [#allocation9], 1 }

</bundles_post_ra>
